<compile_context>
chip_gen: v6e
topology: v6e:2x2x1
jax: 0.10.0
libtpu: 0.0.40
codegen_flags: <defaults>
</compile_context>

<pallas_src>
import functools

import jax
import jax.numpy as jnp
from jax.experimental import pallas as pl
from jax.experimental.pallas import tpu as pltpu


# --------------------------------------------------------------------------------------
# Kernels
# --------------------------------------------------------------------------------------
def _normalize_kernel(x_ref, o_ref):
    """Row-wise L2 normalization (f32 math), cast to o_ref.dtype (bf16 for the MXU)."""
    x = x_ref[...].astype(jnp.float32)
    sq = jnp.sum(x * x, axis=-1, keepdims=True)
    o_ref[...] = (x * jax.lax.rsqrt(sq)).astype(o_ref.dtype)


def _nt_xent_tile_kernel(q_ref, k_ref, loss_ref, denom_acc, pos_acc, *,
                         inv_temp, batch, interleaved):
    i = pl.program_id(0)          # query-tile index
    k = pl.program_id(1)          # key-tile index (reduction axis, last in grid)

    @pl.when(k == 0)
    def _init():
        denom_acc[...] = jnp.zeros_like(denom_acc)
        pos_acc[...] = jnp.zeros_like(pos_acc)

    # (tk, tq) similarity tile: contract D of both operands directly on the MXU
    # (keys on sublanes, queries on lanes -> lane-dense per-query accumulators).
    sim = jax.lax.dot_general(
        k_ref[...], q_ref[...],
        dimension_numbers=(((1,), (1,)), ((), ())),
        preferred_element_type=jnp.float32,
    ) * inv_temp
    # Rows are unit-normalized -> |sim| <= 1/temp, exp is safe without max-subtraction.
    e = jnp.exp(sim)                                            # (tk, tq) f32

    tk_sz, tq_sz = e.shape
    k_idx = k * tk_sz + jax.lax.broadcasted_iota(jnp.int32, (tk_sz, tq_sz), 0)
    q_idx = i * tq_sz + jax.lax.broadcasted_iota(jnp.int32, (tk_sz, tq_sz), 1)

    self_mask = k_idx == q_idx
    if interleaved:
        # features2=None path, original row order: pairs are (2j, 2j+1).
        pos_mask = (k_idx ^ 1) == q_idx
    else:
        # concatenated [out_1; out_2] path: pairs are (r, r +/- B).
        pos_mask = jnp.abs(k_idx - q_idx) == batch

    # denom accumulates everything except the self column (== pos + Ng of the reference).
    denom_acc[...] += jnp.sum(jnp.where(self_mask, 0.0, e), axis=0, keepdims=True)
    pos_acc[...] += jnp.sum(jnp.where(pos_mask, e, 0.0), axis=0, keepdims=True)

    @pl.when(k == pl.num_programs(1) - 1)
    def _finalize():
        # loss = -log(pos / (pos + Ng)) = log(denom) - log(pos); lane-dense (1, tq) row.
        row = jnp.log(denom_acc[...]) - jnp.log(pos_acc[...])
        loss_ref[...] = row[None]                               # (1, 1, tq)


# --------------------------------------------------------------------------------------
# Wrappers
# --------------------------------------------------------------------------------------
def _pick_tile(n, pref):
    """Largest multiple-of-8 divisor of n that is <= pref, else the full extent."""
    if n <= pref:
        return n
    for t in range(pref, 7, -1):
        if n % t == 0 and t % 8 == 0:
            return t
    return n


def _l2_normalize(x, out_dtype, row_tile_pref=256):
    n, d = x.shape
    tr = _pick_tile(n, row_tile_pref)
    return pl.pallas_call(
        _normalize_kernel,
        out_shape=jax.ShapeDtypeStruct((n, d), out_dtype),
        grid=(n // tr,),
        in_specs=[pl.BlockSpec((tr, d), lambda i: (i, 0))],
        out_specs=pl.BlockSpec((tr, d), lambda i: (i, 0)),
        compiler_params=pltpu.CompilerParams(dimension_semantics=("parallel",)),
    )(x)


def _nt_xent_per_row(xn, *, temp, batch, interleaved, q_tile=None, k_tile=None):
    """xn: (2B, D) L2-normalized features -> per-row loss (2B,) f32."""
    n, d = xn.shape
    tq = q_tile if q_tile is not None else _pick_tile(n, 256)
    tk = k_tile if k_tile is not None else _pick_tile(n, 512)
    assert n % tq == 0 and n % tk == 0, (n, tq, tk)
    grid = (n // tq, n // tk)

    kernel = functools.partial(
        _nt_xent_tile_kernel,
        inv_temp=1.0 / float(temp),
        batch=int(batch),
        interleaved=bool(interleaved),
    )

    itemsize = jnp.dtype(xn.dtype).itemsize
    cost = pl.CostEstimate(
        flops=2 * n * n * d,
        transcendentals=n * n,
        bytes_accessed=(grid[0] * n * d + n * d) * itemsize + 4 * n,
    )

    out = pl.pallas_call(
        kernel,
        out_shape=jax.ShapeDtypeStruct((grid[0], 1, tq), jnp.float32),
        grid=grid,
        in_specs=[
            pl.BlockSpec((tq, d), lambda i, k: (i, 0)),   # query tile
            pl.BlockSpec((tk, d), lambda i, k: (k, 0)),   # key tile (reduction axis)
        ],
        out_specs=pl.BlockSpec((1, 1, tq), lambda i, k: (i, 0, 0)),  # lane-dense rows
        scratch_shapes=[
            pltpu.VMEM((1, tq), jnp.float32),   # denom accumulator
            pltpu.VMEM((1, tq), jnp.float32),   # pos accumulator
        ],
        compiler_params=pltpu.CompilerParams(
            dimension_semantics=("parallel", "arbitrary"),
            vmem_limit_bytes=32 * 1024 * 1024,
        ),
        cost_estimate=cost,
    )(xn, xn)
    return out.reshape(n)


def nt_xent_loss(features, features2=None, temp=0.2, average=True,
                 mxu_dtype=jnp.bfloat16, q_tile=None, k_tile=None):
    """Pallas implementation of NT_Xent_Loss.forward (nt_xent in the PyTorch spec)."""
    if features2 is None:
        # Keep the original row order; pairing (2j, 2j+1) is encoded in the kernel's
        # positive-pair index math -> no slice/concat shuffle of the features.
        x = features
        n = x.shape[0]
        b = n // 2
        interleaved = True
    else:
        b = features.shape[0]
        x = jnp.concatenate([features, features2], axis=0)      # (2B, D)
        interleaved = False

    xn = _l2_normalize(x, mxu_dtype)                            # normalize + bf16 once
    loss = _nt_xent_per_row(xn, temp=temp, batch=b, interleaved=interleaved,
                            q_tile=q_tile, k_tile=k_tile)       # (2B,) f32

    if average:
        return jnp.mean(loss)
    if interleaved:
        # per-pair mean in original row order == reference's loss.view(2, B).mean(0)
        return jnp.mean(loss.reshape(b, 2), axis=1)
    return jnp.mean(loss.reshape(2, b), axis=0)


# --------------------------------------------------------------------------------------
# Pure-JAX reference (mirrors the PyTorch code) and self-test
# --------------------------------------------------------------------------------------
def _reference_nt_xent(features, features2=None, temp=0.2, average=True):
    if features2 is None:
        x = features.astype(jnp.float32)
        x = x / jnp.linalg.norm(x, axis=-1, keepdims=True)
        n, d = x.shape
        b = n // 2
        out = x.reshape(b, 2, d)
        out_1, out_2 = out[:, 0], out[:, 1]
    else:
        b = features.shape[0]
        out_1 = features.astype(jnp.float32)
        out_1 = out_1 / jnp.linalg.norm(out_1, axis=-1, keepdims=True)
        out_2 = features2.astype(jnp.float32)
        out_2 = out_2 / jnp.linalg.norm(out_2, axis=-1, keepdims=True)
    o = jnp.concatenate([out_1, out_2], axis=0)
    n = o.shape[0]
    neg = jnp.exp(o @ o.T / temp)
    row = jnp.arange(n)[:, None]
    col = jnp.arange(n)[None, :]
    diff = jnp.mod(col - row, n)
    neg_mask = (diff != 0) & (diff != b)
    ng = jnp.sum(jnp.where(neg_mask, neg, 0.0), axis=-1)
    pos = jnp.exp(jnp.sum(out_1 * out_2, axis=-1) / temp)
    pos = jnp.concatenate([pos, pos], axis=0)
    loss = -jnp.log(pos / (pos + ng))
    return jnp.mean(loss) if average else jnp.mean(loss.reshape(2, b), axis=0)


if __name__ == "__main__":
    key = jax.random.PRNGKey(0)
    k1, k2, k3 = jax.random.split(key, 3)

    # --- Path 1: features2=None (interleaved positive pairs), small shape -------------
    B, D = 8, 32                                  # 2B = 16 rows
    feats = jax.random.normal(k1, (2 * B, D), dtype=jnp.float32)

    loss = jax.block_until_ready(nt_xent_loss(feats, temp=0.2, average=True))
    ref = jax.block_until_ready(_reference_nt_xent(feats, temp=0.2, average=True))
    assert jnp.allclose(loss, ref, rtol=5e-2, atol=5e-2), (loss, ref)   # bf16 MXU path

    # f32 MXU path for a tight-tolerance check against the f32 reference.
    loss32 = jax.block_until_ready(
        nt_xent_loss(feats, temp=0.2, average=True, mxu_dtype=jnp.float32))
    assert jnp.allclose(loss32, ref, rtol=5e-4, atol=5e-4), (loss32, ref)

    # Non-averaged path.
    loss_vec = jax.block_until_ready(nt_xent_loss(feats, temp=0.2, average=False))
    ref_vec = jax.block_until_ready(_reference_nt_xent(feats, temp=0.2, average=False))
    assert loss_vec.shape == (B,)
    assert jnp.allclose(loss_vec, ref_vec, rtol=5e-2, atol=5e-2), (loss_vec, ref_vec)

    # --- Path 2: explicit features2, forced multi-tile grid (4x4) to exercise the -----
    # --- flash-style accumulation across key tiles and multiple query tiles. ----------
    B2, D2 = 32, 32                               # 2B = 64 rows, tiles of 16 -> grid (4,4)
    f1 = jax.random.normal(k2, (B2, D2), dtype=jnp.float32)
    f2 = jax.random.normal(k3, (B2, D2), dtype=jnp.float32)
    loss2 = jax.block_until_ready(
        nt_xent_loss(f1, f2, temp=0.2, average=True, q_tile=16, k_tile=16))
    ref2 = jax.block_until_ready(_reference_nt_xent(f1, f2, temp=0.2, average=True))
    assert jnp.allclose(loss2, ref2, rtol=5e-2, atol=5e-2), (loss2, ref2)

    print("KERNEL_OK")
</pallas_src>

<mosaic_0001>
module attributes {stable_mosaic.version = 11 : i64} {
  func.func @_normalize_kernel(%arg0: i32, %arg1: memref<16x32xf32, #tpu.memory_space<vmem>>, %arg2: memref<16x32xbf16, #tpu.memory_space<vmem>>) attributes {dimension_semantics = [#tpu.dimension_semantics<parallel>], iteration_bounds = array<i64: 1>, scalar_prefetch = 0 : i64, scratch_operands = 0 : i64, tpu.core_type = #tpu.core_type<tc>, window_params = [{transform_indices = @transform_0, window_bounds = array<i64: 16, 32>}, {transform_indices = @transform_1, window_bounds = array<i64: 16, 32>}]} {
    %c0 = arith.constant 0 : index
    %c0_0 = arith.constant 0 : index
    %0 = vector.load %arg1[%c0, %c0_0] : memref<16x32xf32, #tpu.memory_space<vmem>>, vector<16x32xf32>
    %1 = arith.mulf %0, %0 : vector<16x32xf32>
    %cst = arith.constant dense<0.000000e+00> : vector<16xf32>
    %2 = vector.multi_reduction <add>, %1, %cst [1] : vector<16x32xf32> to vector<16xf32>
    %3 = vector.shape_cast %2 : vector<16xf32> to vector<16x1xf32>
    %4 = math.rsqrt %3 : vector<16x1xf32>
    %5 = vector.broadcast %4 : vector<16x1xf32> to vector<16x32xf32>
    %6 = arith.mulf %0, %5 : vector<16x32xf32>
    %7 = arith.truncf %6 : vector<16x32xf32> to vector<16x32xbf16>
    %c0_1 = arith.constant 0 : index
    %c0_2 = arith.constant 0 : index
    %8 = vector.load %arg2[%c0_1, %c0_2] : memref<16x32xbf16, #tpu.memory_space<vmem>>, vector<16x32xbf16>
    tpu.vector_store %arg2[%c0_1, %c0_2], %7 {strides = array<i32>} : memref<16x32xbf16, #tpu.memory_space<vmem>>, vector<16x32xbf16>,
    return
  }
  func.func @transform_0(%arg0: i32) -> (i32, i32) {
    %c0_i32 = arith.constant 0 : i32
    %c0_i32_0 = arith.constant 0 : i32
    return %arg0, %c0_i32 : i32, i32
  }
  func.func @transform_1(%arg0: i32) -> (i32, i32) {
    %c0_i32 = arith.constant 0 : i32
    %c0_i32_0 = arith.constant 0 : i32
    return %arg0, %c0_i32 : i32, i32
  }
}

</mosaic_0001>

<bundles_post_ra>
// kernel: tpu_custom_call.1
= control target key start
LH: loop header
LB: loop body
LE: loop exit
PB: predicated region body
PF: predicated region fallthrough
CT: control target
= control target key end

     0   :  { %6 = vsyncpa [#allocation3], 0  ;;  %s146_s0 = inlined_call_operand.hbm [shape: f32[16,32], index: 0, kind: input, shape index: {}]   ;;  %s147_s1 = inlined_call_operand.hbm [shape: bf16[16,32], index: 1, kind: output, shape index: {}]  }
   0x1   :  { %7 = vsyncpa [#allocation4], 0  ;;  %s124_s6 = smov [#allocation2]  }
   0x2   :  { %s13_s7 = sshll.u32 %s124_s6, 4  ;;  %s14_s7 = int_to_ptr.vmem [resolvable:$true] %s13_s7 }
   0x3   :  { %s88_s8 = scalar_lea.vmem %s14_s7, 256  ;;  %p93_p1 = scmp.lt.s32.totalorder %s14_s7, %s14_s7 }
   0x4   :  { %p89_p0 = scmp.ne.s32.totalorder %s14_s7, %s88_s8  ;;  %p94_p2 = scmp.lt.s32.totalorder %s88_s8, %s88_s8 }
   0x6   :  { %p95_p3 = por %p94_p2, %p93_p1 }
   0x8   :  { %p96_p4 = pnand %p95_p3, %p89_p0 }
   0xa   :  { %99 = shalt.err (!%p96_p4)
}
   0xb   :  { %s125_s9 = smov 128   ;;  %s126_s10 = smov 8  }
   0xc   :  { %19 = dma.hbm_to_vmem [thread:$0]  %s146_s0, 256, %s14_s7, [#allocation3], %s125_s9, %s125_s9, %s126_s10  }
   0xd   :  { %120 = dma.done.wait [#allocation3], 256  }
   0xe   :  { %121 = vsyncadd [#allocation3], 4294967040  ;;  %v23_v0 = vld [vmem:[#allocation2] sm:$0xff]  ;;  %vm27_vm0 = vcmask 261120   ;;  %v24_v1 = vld [vmem:[#allocation2 + $0x8] sm:$0xff]  ;;  %vm46_vm1 = vcmask 257024  }
   0xf   :  { %v25_v2 = vmul.f32 %v23_v0, %v23_v0  ;;  %v26_v3 = vmul.f32 %v24_v1, %v24_v1  ;;  %s127_s0 = smov [#allocation5]  }
  0x10   :  { %s54_s13 = sshll.u32 %s127_s0, 4  ;;  %s55_s13 = int_to_ptr.vmem [resolvable:$true] %s54_s13 }
  0x11   :  { %v28_v4 = vsel %vm27_vm0, %v25_v2, 0.0  ;;  %v31_v5 = vsel %vm27_vm0, %v26_v3, 0.0  ;;  %s100_s14 = scalar_lea.vmem %s55_s13, 128  ;;  %p105_p6 = scmp.lt.s32.totalorder %s55_s13, %s55_s13 }
  0x12   :  { %29 = vadd.xlane.f32.xlu0 %v28_v4  ;;  %p101_p5 = scmp.ne.s32.totalorder %s55_s13, %s100_s14  ;;  %p106_p7 = scmp.lt.s32.totalorder %s100_s14, %s100_s14 }
  0x14   :  { %p107_p8 = por %p106_p7, %p105_p6 }
  0x16   :  { %32 = vadd.xlane.f32.xlu0 %v31_v5  ;;  %p108_p9 = pnand %p107_p8, %p101_p5 }
  0x9b   :  { %v30_v6 = vpop.xlane.xlu0 %29 }
  0x9c   :  { %76 = vrsqrt.f32 %v30_v6 }
  0x9f   :  { %v33_v7 = vpop.xlane.xlu0 %32 }
  0xa0   :  { %78 = vrsqrt.f32 %v33_v7 }
  0xa9   :  { %v77_v8 = vpop.eup %76 }
  0xaa   :  { %v36_v9 = vmul.f32 %v77_v8, %v23_v0 }
  0xac   :  { %v68_v10 = vpack.c.bf16 %v36_v9, %v36_v9 }
  0xad   :  { %v79_v11 = vpop.eup %78 }
  0xae   :  { %v37_v12 = vmul.f32 %v79_v11, %v24_v1  ;;  %47 = vst.msk [vmem:[#allocation5] sm:$0xf] %vm46_vm1, %v68_v10 }
  0xb0   :  { %v69_v13 = vpack.c.bf16 %v37_v12, %v37_v12 }
  0xb2   :  { %48 = vst.msk [vmem:[#allocation5 + $0x4] sm:$0xf] %vm46_vm1, %v69_v13 }
  0xb3   :  { %111 = shalt.err (!%p108_p9)
}
  0xb4   :  { %s128_s15 = smov 64   ;;  %s129_s16 = smov 4  }
  0xb5   :  { %60 = dma.vmem_to_hbm [thread:$0]  %s55_s13, 128, %s147_s1, [#allocation4], %s128_s15, %s128_s15, %s129_s16  }
  0xb6   :  { %122 = dma.done.wait [#allocation4], 128  }
  0xb7   :  { %123 = vsyncadd [#allocation4], 4294967168 }
  0xb8   :  { %64 = vsyncpa [#allocation3], 1 }
  0xb9   :  { %65 = vsyncpa [#allocation4], 1 }

</bundles_post_ra>
